<compile_context>
chip_gen: v5e
topology: v5e:2x2
jax: 0.10.0
libtpu: 0.0.40
codegen_flags: <defaults>
</compile_context>

<pallas_src>
import numpy as np
import jax
import jax.numpy as jnp
from jax.experimental import pallas as pl
from jax.experimental.pallas import tpu as pltpu


def ham_kernel(xaT_ref, m_ref, gb_ref, out_ref):
    """One 128-row batch tile per grid step; BN + sigmoid fused at the last step."""
    i = pl.program_id(0)
    f32 = jnp.float32

    # ---- folded Pauli/circuit quadratic form on a lane-dense (N, TB) tile -------------------
    #   o[b] = xa[b] @ M_eff @ xa[b]^T   (W, 1/2**n_wires and state_p already folded into M_eff)
    xaT = xaT_ref[...]                                              # (N, TB): one f32 vreg
    y = jnp.dot(m_ref[...], xaT, preferred_element_type=f32)       # (N, TB)  single MXU pass
    o_row = jnp.sum(xaT * y, axis=0, keepdims=True)                # (1, TB)  lane-dense pre-BN

    # resident output block (index_map always (0,0,0)) -> stays in VMEM across grid steps
    out_ref[i] = o_row

    # ---- BatchNorm1d (training-mode batch stats over the FULL batch) + sigmoid --------------
    @pl.when(i == pl.num_programs(0) - 1)
    def _():
        o = out_ref[...]                                            # (num_tiles, 1, TB)
        nb = o.shape[0] * o.shape[2]
        mu = jnp.sum(jnp.sum(o, axis=2, keepdims=True), axis=0, keepdims=True) / nb
        d = o - mu
        var = jnp.sum(jnp.sum(d * d, axis=2, keepdims=True), axis=0, keepdims=True) / nb
        o = d * jax.lax.rsqrt(var + 1e-5)                           # EUP rsqrt
        o = o * gb_ref[0] + gb_ref[1]                               # BN affine (SMEM scalars)
        out_ref[...] = 0.5 * (jnp.tanh(0.5 * o) + 1.0)              # sigmoid via EUP tanh


def ham_forward(x, seq_lengths, params):
    """x: (B, L, emb_dim) float32, seq_lengths: (B,) int32 -> ((B,), state)."""
    B, L, E = x.shape
    N = params["N"]
    M_stack = params["M_stack"]                                     # (N, N) folded real matrix

    # ---- wrapper-side prep (tiny, XLA-fused): seq-average, pad, transpose to lane-dense -----
    lens = jnp.maximum(seq_lengths, 1).astype(jnp.float32)          # clamp zero lengths
    xa = jnp.sum(x.astype(jnp.float32), axis=1) / lens[:, None]     # (B, E)
    xa = jnp.pad(xa, ((0, 0), (0, N - E)))                          # (B, N)
    xaT = xa.T                                                      # (N, B): B along lanes

    TB = 128 if B % 128 == 0 else B                                 # batch-tile of 128 lanes
    num_tiles = B // TB

    out3d = pl.pallas_call(
        ham_kernel,
        out_shape=jax.ShapeDtypeStruct((num_tiles, 1, TB), jnp.float32),
        grid=(num_tiles,),
        in_specs=[
            pl.BlockSpec((N, TB), lambda i: (0, i)),                # xaT tile: one vreg per step
            pl.BlockSpec((N, N), lambda i: (0, 0)),                 # folded M_eff (broadcast)
            pl.BlockSpec(memory_space=pltpu.MemorySpace.SMEM),      # [gamma, beta] scalars
        ],
        out_specs=pl.BlockSpec((num_tiles, 1, TB), lambda i: (0, 0, 0)),  # resident, lane-dense
        compiler_params=pltpu.CompilerParams(
            # cross-tile BatchNorm stats -> sequential grid (exact batch statistics)
            dimension_semantics=("arbitrary",)),
    )(xaT, M_stack, params["gb"])

    out = out3d.reshape(B)
    # state is input-independent for circ_in='zeros' -> returned from the wrapper precompute
    return out, params["state"]


# ----------------------------- pure-JAX reference -----------------------------
def reference_forward(x, seq_lengths, U, perms, signs, W, gamma, beta, N):
    B, L, E = x.shape
    sl = jnp.where(seq_lengths == 0, 1, seq_lengths)
    xa = jnp.sum(x, axis=1) / sl[:, None].astype(jnp.float32)
    xa = jnp.pad(xa, ((0, 0), (0, N - E)))

    sent = jnp.zeros((1, N), jnp.complex64).at[0, 0].set(1.0 + 0j)
    state = sent @ U.T

    perms_j = jnp.asarray(perms)
    signs_j = jnp.asarray(signs)

    def eval_paulis(xc, reweight_W=None):
        g = xc[:, perms_j.T]                              # (B, N, P): x[b, perm[p, i]]
        x_sign = g * signs_j.T[None]                      # * signs[p, i]
        if reweight_W is not None:
            return jnp.einsum('bN,bNp,pc->bc', xc.conj(), x_sign,
                              reweight_W.astype(jnp.complex64))
        return jnp.einsum('bN,bNp->b', xc.conj(), x_sign)[:, None]

    x_p = eval_paulis(xa.astype(jnp.complex64), W) / N
    state_p = eval_paulis(state)
    out = (x_p * state_p).real
    mu = out.mean(0, keepdims=True)
    var = ((out - mu) ** 2).mean(0, keepdims=True)
    out = (out - mu) / jnp.sqrt(var + 1e-5) * gamma + beta
    out = jax.nn.sigmoid(out).squeeze()
    return out, state


if __name__ == "__main__":
    # -------- sizes: small per-example shapes, batch tiled 2 x 128 for the grid --------
    B, L, emb_dim = 256, 8, 6
    n_wires = (emb_dim - 1).bit_length()          # 3
    N = 2 ** n_wires                              # 8
    n_paulis = 16
    n_classes = 2
    C = 1                                         # reweighting columns for n_classes == 2

    key = jax.random.PRNGKey(0)
    k_pauli, k_u, k_w, k_x, k_len = jax.random.split(key, 5)

    # -------- Pauli strings -> kron matrices, perms, signs (setup glue) --------
    I2 = np.eye(2, dtype=np.complex64)
    X = np.array([[0, 1], [1, 0]], dtype=np.complex64)
    Y = np.array([[0, -1j], [1j, 0]], dtype=np.complex64)
    Z = np.array([[1, 0], [0, -1]], dtype=np.complex64)
    all_paulis = [I2, X, Y, Z]

    pauli_strings = np.asarray(jax.random.randint(k_pauli, (n_paulis, n_wires), 0, 4))
    mats = []
    for row in pauli_strings:
        M = all_paulis[int(row[0])]
        for p in row[1:]:
            M = np.kron(M, all_paulis[int(p)])
        mats.append(M)
    M_all = np.stack(mats).astype(np.complex64)                       # (P, N, N)
    perms = np.rint(np.abs(M_all @ np.arange(N))).astype(np.int32)    # (P, N)
    signs = (M_all @ np.ones(N)).astype(np.complex64)                 # (P, N)

    # -------- deterministic circuit unitary (stand-in for Circuit) --------
    a = np.asarray(jax.random.normal(k_u, (N, N, 2), jnp.float32)).astype(np.float64)
    U = np.linalg.qr(a[..., 0] + 1j * a[..., 1])[0].astype(np.complex64)

    # -------- parameters --------
    W = jax.random.uniform(k_w, (n_paulis, C), jnp.float32)           # reweighting ~ torch.rand
    gamma, beta = 0.75, 0.25                                          # BatchNorm1d affine params

    # -------- wrapper-side precompute (input independent for circ_in='zeros') --------
    # state = |0...0> @ U^T, state_p = sum_p <state|P_p|state>
    s0 = np.zeros((1, N), np.complex128)
    s0[0, 0] = 1.0
    state_np = s0 @ U.T.astype(np.complex128)                         # (1, N)
    sv = state_np[0]
    sp = np.einsum('i,pij,j->', sv.conj(), M_all.astype(np.complex128), sv)

    # fold W, 1/2**n_wires and state_p into one effective real matrix (C = 1)
    W_np = np.asarray(W, np.float64)                                  # (P, 1)
    M_signed = (M_all.real.astype(np.float64) * sp.real
                - M_all.imag.astype(np.float64) * sp.imag)            # (P, N, N)
    M_eff = np.einsum('pc,pij->cij', W_np, M_signed)[0] / N           # (N, N)

    params = dict(
        N=N,
        M_stack=jnp.asarray(M_eff, jnp.float32),                      # (N, N)
        gb=jnp.asarray([gamma, beta], jnp.float32),                   # SMEM scalars
        state=jnp.asarray(state_np.astype(np.complex64)),
    )

    # -------- example inputs --------
    x = jax.random.normal(k_x, (B, L, emb_dim), jnp.float32)
    seq_lengths = jax.random.randint(k_len, (B,), 0, L + 1).astype(jnp.int32)

    out, state = ham_forward(x, seq_lengths, params)
    (out, state) = jax.block_until_ready((out, state))

    # -------- correctness check against a pure-JAX (gather-based) reference --------
    out_ref, state_ref = reference_forward(
        x, seq_lengths, jnp.asarray(U), perms, signs, W, gamma, beta, N)
    out_ref, state_ref = jax.block_until_ready((out_ref, state_ref))

    assert out.shape == (B,)
    assert np.allclose(np.asarray(out), np.asarray(out_ref), rtol=2e-3, atol=1e-3), \
        (np.asarray(out)[:8], np.asarray(out_ref)[:8])
    assert np.allclose(np.asarray(state), np.asarray(state_ref), rtol=1e-4, atol=1e-5)

    print("KERNEL_OK")
</pallas_src>

<mosaic_0001>
module attributes {stable_mosaic.version = 11 : i64} {
  func.func @ham_kernel(%arg0: i32, %arg1: memref<8x128xf32, #tpu.memory_space<vmem>>, %arg2: memref<8x8xf32, #tpu.memory_space<vmem>>, %arg3: memref<2xf32, #tpu.memory_space<smem>>, %arg4: memref<2x1x128xf32, #tpu.memory_space<vmem>>) attributes {dimension_semantics = [#tpu.dimension_semantics<arbitrary>], iteration_bounds = array<i64: 2>, scalar_prefetch = 0 : i64, scratch_operands = 0 : i64, tpu.core_type = #tpu.core_type<tc>, window_params = [{transform_indices = @transform_0, window_bounds = array<i64: 8, 128>}, {pipeline_mode = #tpu.pipeline_mode<synchronous>, transform_indices = @transform_1, window_bounds = array<i64: 8, 8>}, {transform_indices = @transform_2, window_bounds = array<i64: 2>}, {pipeline_mode = #tpu.pipeline_mode<synchronous>, transform_indices = @transform_3, window_bounds = array<i64: 2, 1, 128>}]} {
    %c0 = arith.constant 0 : index
    %c0_0 = arith.constant 0 : index
    %0 = vector.load %arg1[%c0, %c0_0] : memref<8x128xf32, #tpu.memory_space<vmem>>, vector<8x128xf32>
    %c0_1 = arith.constant 0 : index
    %c0_2 = arith.constant 0 : index
    %1 = vector.load %arg2[%c0_1, %c0_2] : memref<8x8xf32, #tpu.memory_space<vmem>>, vector<8x8xf32>
    %cst = arith.constant dense<0.000000e+00> : vector<8x128xf32>
    %2 = tpu.matmul %1, %0, %cst {dimension_numbers = #tpu.dot_dimension_numbers<[1], [0], [0], [1], [0, 0, 1, 1], [], []>} : vector<8x8xf32>, vector<8x128xf32>, vector<8x128xf32> -> vector<8x128xf32>
    %3 = arith.mulf %0, %2 : vector<8x128xf32>
    %cst_3 = arith.constant dense<0.000000e+00> : vector<128xf32>
    %4 = vector.multi_reduction <add>, %3, %cst_3 [0] : vector<8x128xf32> to vector<128xf32>
    %5 = vector.shape_cast %4 : vector<128xf32> to vector<1x128xf32>
    %6 = arith.index_cast %arg0 : i32 to index
    %c0_4 = arith.constant 0 : index
    %c0_5 = arith.constant 0 : index
    %7 = vector.load %arg4[%6, %c0_4, %c0_5] : memref<2x1x128xf32, #tpu.memory_space<vmem>>, vector<1x1x128xf32>
    %8 = vector.shape_cast %7 : vector<1x1x128xf32> to vector<1x128xf32>
    %9 = vector.shape_cast %5 : vector<1x128xf32> to vector<1x1x128xf32>
    tpu.vector_store %arg4[%6, %c0_4, %c0_5], %9 {strides = array<i32>} : memref<2x1x128xf32, #tpu.memory_space<vmem>>, vector<1x1x128xf32>,
    %c1_i32 = arith.constant 1 : i32
    %10 = arith.cmpi eq, %arg0, %c1_i32 : i32
    %11 = arith.extui %10 : i1 to i32
    %c0_i32 = arith.constant 0 : i32
    %12 = arith.cmpi ne, %11, %c0_i32 : i32
    scf.if %12 {
      %c0_6 = arith.constant 0 : index
      %c0_7 = arith.constant 0 : index
      %c0_8 = arith.constant 0 : index
      %13 = vector.load %arg4[%c0_6, %c0_7, %c0_8] : memref<2x1x128xf32, #tpu.memory_space<vmem>>, vector<2x1x128xf32>
      %cst_9 = arith.constant dense<0.000000e+00> : vector<2x1xf32>
      %14 = vector.multi_reduction <add>, %13, %cst_9 [2] : vector<2x1x128xf32> to vector<2x1xf32>
      %15 = vector.shape_cast %14 : vector<2x1xf32> to vector<2x1x1xf32>
      %cst_10 = arith.constant dense<0.000000e+00> : vector<1x1xf32>
      %16 = vector.multi_reduction <add>, %15, %cst_10 [0] : vector<2x1x1xf32> to vector<1x1xf32>
      %17 = vector.shape_cast %16 : vector<1x1xf32> to vector<1x1x1xf32>
      %cst_11 = arith.constant 2.560000e+02 : f32
      %18 = vector.broadcast %cst_11 : f32 to vector<1x1x1xf32>
      %19 = arith.divf %17, %18 : vector<1x1x1xf32>
      %20 = vector.broadcast %19 : vector<1x1x1xf32> to vector<2x1x128xf32>
      %21 = arith.subf %13, %20 : vector<2x1x128xf32>
      %22 = arith.mulf %21, %21 : vector<2x1x128xf32>
      %cst_12 = arith.constant dense<0.000000e+00> : vector<2x1xf32>
      %23 = vector.multi_reduction <add>, %22, %cst_12 [2] : vector<2x1x128xf32> to vector<2x1xf32>
      %24 = vector.shape_cast %23 : vector<2x1xf32> to vector<2x1x1xf32>
      %cst_13 = arith.constant dense<0.000000e+00> : vector<1x1xf32>
      %25 = vector.multi_reduction <add>, %24, %cst_13 [0] : vector<2x1x1xf32> to vector<1x1xf32>
      %26 = vector.shape_cast %25 : vector<1x1xf32> to vector<1x1x1xf32>
      %cst_14 = arith.constant 2.560000e+02 : f32
      %27 = vector.broadcast %cst_14 : f32 to vector<1x1x1xf32>
      %28 = arith.divf %26, %27 : vector<1x1x1xf32>
      %cst_15 = arith.constant 9.99999974E-6 : f32
      %29 = vector.broadcast %cst_15 : f32 to vector<1x1x1xf32>
      %30 = arith.addf %28, %29 : vector<1x1x1xf32>
      %31 = math.rsqrt %30 : vector<1x1x1xf32>
      %32 = vector.broadcast %31 : vector<1x1x1xf32> to vector<2x1x128xf32>
      %33 = arith.mulf %21, %32 : vector<2x1x128xf32>
      %c0_16 = arith.constant 0 : index
      %34 = memref.load %arg3[%c0_16] : memref<2xf32, #tpu.memory_space<smem>>
      %35 = vector.broadcast %34 : f32 to vector<2x1x128xf32>
      %36 = arith.mulf %33, %35 : vector<2x1x128xf32>
      %c1 = arith.constant 1 : index
      %37 = memref.load %arg3[%c1] : memref<2xf32, #tpu.memory_space<smem>>
      %38 = vector.broadcast %37 : f32 to vector<2x1x128xf32>
      %39 = arith.addf %36, %38 : vector<2x1x128xf32>
      %cst_17 = arith.constant 5.000000e-01 : f32
      %40 = vector.broadcast %cst_17 : f32 to vector<2x1x128xf32>
      %41 = arith.mulf %40, %39 : vector<2x1x128xf32>
      %42 = math.tanh %41 : vector<2x1x128xf32>
      %cst_18 = arith.constant 1.000000e+00 : f32
      %43 = vector.broadcast %cst_18 : f32 to vector<2x1x128xf32>
      %44 = arith.addf %42, %43 : vector<2x1x128xf32>
      %cst_19 = arith.constant 5.000000e-01 : f32
      %45 = vector.broadcast %cst_19 : f32 to vector<2x1x128xf32>
      %46 = arith.mulf %45, %44 : vector<2x1x128xf32>
      %c0_20 = arith.constant 0 : index
      %c0_21 = arith.constant 0 : index
      %c0_22 = arith.constant 0 : index
      %47 = vector.load %arg4[%c0_20, %c0_21, %c0_22] : memref<2x1x128xf32, #tpu.memory_space<vmem>>, vector<2x1x128xf32>
      tpu.vector_store %arg4[%c0_20, %c0_21, %c0_22], %46 {strides = array<i32>} : memref<2x1x128xf32, #tpu.memory_space<vmem>>, vector<2x1x128xf32>,
    } else {
    }
    return
  }
  func.func @transform_0(%arg0: i32) -> (i32, i32) {
    %c0_i32 = arith.constant 0 : i32
    %c0_i32_0 = arith.constant 0 : i32
    return %c0_i32, %arg0 : i32, i32
  }
  func.func @transform_1(%arg0: i32) -> (i32, i32) {
    %c0_i32 = arith.constant 0 : i32
    %c0_i32_0 = arith.constant 0 : i32
    %c0_i32_1 = arith.constant 0 : i32
    return %c0_i32, %c0_i32_0 : i32, i32
  }
  func.func @transform_2(%arg0: i32) -> i32 {
    %c0_i32 = arith.constant 0 : i32
    %c0_i32_0 = arith.constant 0 : i32
    return %c0_i32 : i32
  }
  func.func @transform_3(%arg0: i32) -> (i32, i32, i32) {
    %c0_i32 = arith.constant 0 : i32
    %c0_i32_0 = arith.constant 0 : i32
    %c0_i32_1 = arith.constant 0 : i32
    %c0_i32_2 = arith.constant 0 : i32
    return %c0_i32, %c0_i32_0, %c0_i32_1 : i32, i32, i32
  }
}

</mosaic_0001>

<bundles_post_ra>
// kernel: tpu_custom_call.1
= control target key start
LH: loop header
LB: loop body
LE: loop exit
PB: predicated region body
PF: predicated region fallthrough
CT: control target
= control target key end

     0   :  { %8 = vsyncpa [#allocation3], 0  ;;  %s789_s0 = inlined_call_operand.hbm [shape: f32[8,256], index: 0, kind: input, shape index: {}]   ;;  %s790_s1 = inlined_call_operand.hbm [shape: f32[8,8], index: 1, kind: input, shape index: {}]   ;;  %s791_s2 = inlined_call_operand.vmem [shape: f32[2], index: 2, kind: input, shape index: {}]   ;;  %s792_s3 = inlined_call_operand.hbm [shape: f32[2,1,128], index: 3, kind: output, shape index: {}]  }
   0x1   :  { %10 = vsyncpa [#allocation3 + $0x1], 0 }
   0x2   :  { %11 = vsyncpa [#allocation7], 0 }
   0x3   :  { %12 = vsyncpa [#allocation5], 0 }
   0x4   :  { %13 = vsyncpa [#allocation4], 0  ;;  %s670_s12 = smov 0   ;;  %s672_s13 = smov 0  }
   0x5   :  { %s674_s14 = smov 0   ;;  %s676_s15 = smov 0  }
   0x6 LB: > { %s689_s16 = sadd.s32 4294967295, %s642_s15   ;;  %p39_p0 = scmp.ne.s32.totalorder %s634_s13, %s630_s12  ;;  %s642_s15 = sphi %s676_s15, %s799_s15   ;;  %s638_s14 = sphi %s674_s14, %s798_s14   ;;  %s634_s13 = sphi %s672_s13, %s797_s13   ;;  %s630_s12 = sphi %s670_s12, %s796_s12  }
   0x7   : > { %p40_p1 = scmp.eq.s32.totalorder %s689_s16, 0  ;;  %p394_p2 = scmp.ge.s32.totalorder %s642_s15, 1 }
   0x8   : > { %p113_p3 = scmp.lt.s32.totalorder %s642_s15, 3  ;;  %s125_s20 = sshll.u32 %s790_s1, 4  ;;  %s126_s20 = int_to_ptr.hbm [resolvable:$true] %s125_s20 }
   0x9   : > { %p697_p4 = por %p40_p1, %p39_p0  ;;  %s644_s22 = smov [#allocation6]  }
   0xa   : > { %p704_p5 = pnand %p394_p2, %p113_p3  ;;  %s127_s23 = sshll.u32 %s644_s22, 4  ;;  %s128_s23 = int_to_ptr.vmem [resolvable:$true] %s127_s23 }
   0xb   : > { %s137_s26 = sshll.u32 %s791_s2, 4  ;;  %s645_s27 = smov [#allocation8]   ;;  %s138_s26 = int_to_ptr.vmem [resolvable:$true] %s137_s26 }
   0xc   : > { %p429_p6 = pneg %p704_p5  ;;  %s716_s28 = sadd.s32 1, %s642_s15  }
   0xd   : > { %s26_s29 = sadd.s32 1, %s638_s14  ;;  %s23_s30 = ssub.s32 %s642_s15, %s716_s28 }
   0xe   : > { %p430_p7 = pnand %p429_p6, %p40_p1  ;;  %p33_p8 = scmp.ne.s32.totalorder %s638_s14, %s634_s13 }
   0xf   : > { %p24_p9 = scmp.eq.s32.totalorder %s23_s30, 0  ;;  %p34_p10 = scmp.eq.s32.totalorder %s642_s15, 0 }
  0x10   : > { %432 = dma.hbm_to_vmem [thread:$0]  (!%p430_p7), %s126_s20, 128, %s128_s23, [#allocation7]  }
  0x11   : > { %435 = dma.vmem_to_smem (!%p430_p7), %s138_s26, 16, %s645_s27, [#allocation5]  }
  0x12   : > { %s148_s4 = sand.u32 1, %s638_s14   ;;  %p35_p11 = por %p34_p10, %p33_p8 }
  0x13   : > { %s726_s5 = scalar_select %p24_p9, %s638_s14, %s26_s29  }
  0x14   : > { %p442_p12 = scmp.lt.s32.totalorder %s642_s15, 2  ;;  %s398_s6 = sshll.u32 %s148_s4, 3 }
  0x15   : > { %s399_s7 = sshll.u32 %s642_s15, 3  ;;  %s152_s12 = scalar_lea.vmem [#allocation2], %s398_s6 }
  0x16   : > { %s156_s10 = scalar_lea.hbm %s789_s0, %s399_s7  ;;  %s160_s18 = sshll.u32 %s152_s12, 4  ;;  %s161_s18 = int_to_ptr.vmem [resolvable:$true] %s160_s18 }
  0x17   : > { %s158_s11 = sshll.u32 %s156_s10, 4  ;;  %p733_p13 = pnand %p442_p12, %p35_p11  ;;  %s159_s11 = int_to_ptr.hbm [resolvable:$true] %s158_s11 }
  0x18   : > { %s149_s20 = scalar_lea.sflag [#allocation3], %s148_s4  ;;  %s538_s22 = sshra.s32 %s159_s11, 4  ;;  %s539_s22 = int_to_ptr.hbm [resolvable:$true] %s538_s22 }
  0x19   : > { %s540_s23 = scalar_lea.hbm %s539_s22, 8  ;;  %p542_p2 = pneg %p733_p13 }
  0x1a   : > { %p541_p0 = scmp.ne.s32.totalorder %s539_s22, %s540_s23  ;;  %s545_s26 = scalar_lea.hbm %s789_s0, 16 }
  0x1b   : > { %p546_p7 = scmp.lt.s32.totalorder %s539_s22, %s789_s0  ;;  %p547_p8 = scmp.lt.s32.totalorder %s545_s26, %s540_s23 }
  0x1c   : > { %p543_p3 = pnand %p542_p2, %p541_p0 }
  0x1d   : > { %p548_p9 = por %p547_p8, %p546_p7 }
  0x1e   : > { %p544_p6 = pneg %p543_p3 }
  0x20   : > { %p549_p10 = pnand %p548_p9, %p544_p6 }
  0x22   : > { %552 = shalt.err (!%p549_p10)
}
  0x23   : > { %439 = dma.hbm_to_vmem [thread:$0]  (!%p733_p13), %s159_s11, 128, %s161_s18, %s149_s20  }
  0x24   : > { %169 = sbr.rel (%p704_p5) target bundleno = 509 (0x1fd), region = 32  ;;  %s171_s30 = sand.u32 (!%p704_p5), 1, %s634_s13  }
  0x25   : > { %s401_s4 = sshll.u32 (!%p704_p5), %s171_s30, 3  ;;  %s172_s6 = scalar_lea.sflag (!%p704_p5), [#allocation3], %s171_s30 }
  0x26   : > { %s175_s7 = scalar_lea.vmem (!%p704_p5), [#allocation2], %s401_s4 }
  0x29   : > { %613 = dma.done.wait (%p697_p4), %s172_s6, 128  }
  0x2a   : > { %615 = vsyncadd (%p697_p4), %s172_s6, 4294967168 }
  0x2b   : > { %617 = dma.done.wait (%p40_p1), [#allocation7], 128  }
  0x2c   : > { %619 = vsyncadd (%p40_p1), [#allocation7], 4294967168 }
  0x2d   : > { %621 = dma.done.wait (%p40_p1), [#allocation5], 16  }
  0x2e   : > { %623 = vsyncadd (%p40_p1), [#allocation5], 4294967280 }
  0x2f   : > { %191 = sfence }
  0x30   : > { %v205_v0 = vld [vmem:[%s175_s7] sm:$0xff]  ;;  %v206_v1 = vld [vmem:[#allocation6] sm:$0xff]  ;;  %vm207_vm0 = vcmask 64512   ;;  %s412_s17 = scalar_lea.vmem [#allocation9], %s642_s15  ;;  %p406_p4 = scmp.ne.s32.totalorder %s689_s16, 1 }
  0x31   : > { %226 = vmatpush.msra.mxu0 %v205_v0  ;;  %s291_s15 = sld [smem:[#allocation8]] (!%p406_p4) }
  0x32   : > { %404 = vmatmul.msk.f32.vlgmr.msra.gmra.mxu0 %vm207_vm0, %v206_v1  ;;  %s407_s21 = sld [smem:[#allocation8 + $0x1]] (!%p406_p4) }
  0xaf   : > { %v228_v2 = vpop.f32.mrf.mxu0 }
  0xb0   : > { %v231_v3 = vmul.f32 %v228_v2, %v205_v0 }
  0xb2   : > { %v232_v4 = vrot.slane %v231_v3, 4 }
  0xb4   : > { %v233_v5 = vadd.f32 %v232_v4, %v231_v3 }
  0xb6   : > { %v234_v6 = vrot.slane %v233_v5, 2 }
  0xb8   : > { %v235_v7 = vadd.f32 %v234_v6, %v233_v5 }
  0xba   : > { %v236_v8 = vrot.slane %v235_v7, 1  ;;  %243 = sbr.rel (%p406_p4) target bundleno = 503 (0x1f7), region = 48 }
  0xbc   : > { %v237_v9 = vadd.f32 %v236_v8, %v235_v7 }
  0xbe   : > { %414 = vst [vmem:[%s412_s17 - $0x1] sm:$0x1] %v237_v9 }
  0xbf   : > { %vm246_vm1 = vcmask 1040384   ;;  %v646_v14 = vmov 256.0   ;;  %v292_v46 = vstv %s291_s15  ;;  %v296_v50 = vstv %s407_s21 }
  0xc0   : > { %485 = vrcp.f32 %v646_v14 }
  0xc5   : > { %v244_v10 = vld [vmem:[#allocation9] sm:$0x1]  ;;  %v245_v12 = vld [vmem:[#allocation9 + $0x1] sm:$0x1] }
  0xc6   : > { %v247_v11 = vsel %vm246_vm1, %v244_v10, 0.0  ;;  %v250_v13 = vsel %vm246_vm1, %v245_v12, 0.0  ;;  %v486_v15 = vpop.eup %485 }
  0xc7   : > { %248 = vadd.xlane.f32.xlu0 %v247_v11  ;;  %v257_v16 = vmul.f32 256.0, %v486_v15  ;;  %vm261_vm2 = vweird.f32 %v486_v15 }
  0xc9   : > { %v258_v17 = vsub.f32 1.0, %v257_v16 }
  0xcb   : > { %v259_v19 = vmul.f32 %v486_v15, %v258_v17 }
  0xcd   : > { %v260_v20 = vadd.f32 %v486_v15, %v259_v19 }
  0xcf   : > { %251 = vadd.xlane.f32.xlu0 %v250_v13  ;;  %v262_v23 = vsel %vm261_vm2, %v486_v15, %v260_v20 }
 0x13a   : > { %v249_v18 = vpop.xlane.xlu0 %248 }
 0x13b   : > { %v253_v22 = vsel %vm246_vm1, %v249_v18, 0.0 }
 0x142   : > { %v252_v21 = vpop.xlane.xlu0 %251 }
 0x143   : > { %v254_v24 = vsel %vm246_vm1, %v252_v21, 0.0 }
 0x144   : > { %v255_v25 = vadd.f32 %v254_v24, %v253_v22 }
 0x146   : > { %v263_v26 = vmul.f32 %v262_v23, %v255_v25 }
 0x148   : > { %v264_v27 = vsub.f32 %v244_v10, %v263_v26  ;;  %v265_v30 = vsub.f32 %v245_v12, %v263_v26 }
 0x14a   : > { %v266_v28 = vmul.f32 %v264_v27, %v264_v27  ;;  %v267_v31 = vmul.f32 %v265_v30, %v265_v30 }
 0x14c   : > { %v268_v29 = vsel %vm246_vm1, %v266_v28, 0.0  ;;  %v271_v32 = vsel %vm246_vm1, %v267_v31, 0.0 }
 0x14d   : > { %269 = vadd.xlane.f32.xlu1 %v268_v29 }
 0x155   : > { %272 = vadd.xlane.f32.xlu1 %v271_v32 }
 0x1c0   : > { %v270_v33 = vpop.xlane.xlu1 %269 }
 0x1c1   : > { %v274_v35 = vsel %vm246_vm1, %v270_v33, 0.0 }
 0x1c8   : > { %v273_v34 = vpop.xlane.xlu1 %272 }
 0x1c9   : > { %v275_v36 = vsel %vm246_vm1, %v273_v34, 0.0 }
 0x1ca   : > { %v276_v37 = vadd.f32 %v275_v36, %v274_v35 }
 0x1cc   : > { %v277_v38 = vmul.f32 %v276_v37, %v262_v23 }
 0x1ce   : > { %v278_v39 = vadd.f32 1e-05, %v277_v38 }
 0x1d0   : > { %487 = vrsqrt.f32 %v278_v39  ;;  %vm285_vm4 = vweird.f32 %v278_v39 }
 0x1d6   : > { %v488_v40 = vpop.eup %487 }
 0x1d7   : > { %v280_v41 = vmul.f32 %v488_v40, %v278_v39  ;;  %vm286_vm3 = vweird.f32 %v488_v40 }
 0x1d8   : > { %vm287_vm5 = vmor %vm285_vm4, %vm286_vm3 }
 0x1d9   : > { %v281_v42 = vmul.f32 %v488_v40, %v280_v41 }
 0x1db   : > { %v282_v43 = vmul.f32 0.5, %v281_v42 }
 0x1dd   : > { %v283_v44 = vsub.f32 1.5, %v282_v43 }
 0x1df   : > { %v284_v45 = vmul.f32 %v488_v40, %v283_v44 }
 0x1e1   : > { %v288_v47 = vsel %vm287_vm5, %v488_v40, %v284_v45 }
 0x1e2   : > { %v289_v48 = vmul.f32 %v288_v47, %v264_v27  ;;  %v290_v49 = vmul.f32 %v288_v47, %v265_v30 }
 0x1e4   : > { %v293_v51 = vmul.f32 %v292_v46, %v289_v48  ;;  %v294_v52 = vmul.f32 %v292_v46, %v290_v49 }
 0x1e6   : > { %v297_v53 = vadd.f32 %v296_v50, %v293_v51  ;;  %v298_v54 = vadd.f32 %v296_v50, %v294_v52 }
 0x1e8   : > { %v299_v55 = vmul.f32 0.5, %v297_v53  ;;  %v300_v56 = vmul.f32 0.5, %v298_v54 }
 0x1ea   : > { %489 = vtanh.f32 %v299_v55 }
 0x1eb   : > { %491 = vtanh.f32 %v300_v56 }
 0x1f0   : > { %v490_v57 = vpop.eup %489 }
 0x1f1   : > { %v492_v58 = vpop.eup %491  ;;  %v303_v59 = vadd.f32 1.0, %v490_v57 }
 0x1f2   : > { %v304_v60 = vadd.f32 1.0, %v492_v58 }
 0x1f3   : > { %v305_v61 = vmul.f32 0.5, %v303_v59 }
 0x1f4   : > { %v306_v62 = vmul.f32 0.5, %v304_v60 }
 0x1f5   : > { %307 = vst [vmem:[#allocation9] sm:$0x1] %v305_v61 }
 0x1f6   : > { %308 = vst [vmem:[#allocation9 + $0x1] sm:$0x1] %v306_v62 }
 0x1f7 PF: > { %p445_p1 = scmp.eq.s32.totalorder %s689_s16, 1  ;;  %s647_s8 = smov [#allocation9]  }
 0x1f8   : > { %s314_s9 = sshll.u32 %s647_s8, 4  ;;  %s316_s12 = sshll.u32 %s792_s3, 4  ;;  %s315_s9 = int_to_ptr.vmem [resolvable:$true] %s314_s9  ;;  %s317_s12 = int_to_ptr.hbm [resolvable:$true] %s316_s12 }
 0x1f9   : > { %s648_s18 = smov 16   ;;  %s649_s19 = smov 1  }
 0x1fa   : > { %426 = dma.vmem_to_hbm [thread:$0]  (%p445_p1), %s315_s9, 32, %s317_s12, [#allocation4], %s648_s18, %s648_s18, %s649_s19  }
 0x1fb   : > { %625 = dma.done.wait (%p445_p1), [#allocation4], 32  }
 0x1fc   : > { %627 = vsyncadd (%p445_p1), [#allocation4], 4294967264 }
 0x1fd PF: > { %p16_p5 = scmp.ge.s32.totalorder %s716_s28, 4   ;;  %s796_s12 = smov %s634_s13 }
 0x1fe   : > { %s797_s13 = smov %s638_s14  ;;  %s798_s14 = smov %s726_s5 }
 0x1ff   : > { %s799_s15 = smov %s716_s28  ;;  %18 = sbr.rel (!%p16_p5) target bundleno = 6 (0x6), region = 83 }
 0x204   :  { %333 = vsyncpa [#allocation3], 1 }
 0x205   :  { %335 = vsyncpa [#allocation3 + $0x1], 1 }
 0x206   :  { %336 = vsyncpa [#allocation7], 1 }
 0x207   :  { %337 = vsyncpa [#allocation4], 1 }
 0x208   :  { %339 = vsyncpa [#allocation4 + $0x1], 1 }
 0x209   :  { %340 = vsyncpa [#allocation5], 1 }
 0x20a   :  { %342 = vsyncpa [#allocation5 + $0x1], 1 }

</bundles_post_ra>
